<compile_context>
chip_gen: v6e
topology: v6e:2x2x1
jax: 0.10.0
libtpu: 0.0.40
codegen_flags: <defaults>
</compile_context>

<pallas_src>
import functools

import jax
import jax.numpy as jnp
from jax.experimental import pallas as pl
from jax.experimental.pallas import tpu as pltpu


def _round_up(x, m):
    return (x + m - 1) // m * m


def _vmem_bytes(tb, dims):
    """Rough VMEM footprint: double-buffered x/out tiles + resident params +
    f32 per-layer intermediates (lane dim rounds to 128 in VMEM layout)."""
    num_layers = len(dims) - 1
    b = 0
    b += 2 * tb * dims[0] * 4          # x tile (double buffered)
    b += 2 * tb * dims[-1] * 4         # out tile (double buffered)
    for i in range(num_layers):        # weights + biases (double buffered)
        b += 2 * (dims[i] * dims[i + 1] * 4 + dims[i + 1] * 4)
    for d in dims:                     # f32 intermediates / input slab
        b += tb * _round_up(d, 128) * 4
    return b


def _mlp_kernel(num_layers, *refs):
    """Fused MLP forward on one batch tile.

    refs = (x_ref, w0, b0, w1, b1, ..., w_{L-1}, b_{L-1}, out_ref)
    All operands are f32 at their natural (unpadded) feature widths.
    """
    x_ref = refs[0]
    out_ref = refs[-1]
    params = refs[1:-1]

    h = x_ref[...]
    for i in range(num_layers):
        w = params[2 * i][...]                 # [in_i, out_i] f32
        b = params[2 * i + 1][...]             # [1, out_i]   f32
        h = jnp.dot(h, w, preferred_element_type=jnp.float32) + b
        if i < num_layers - 1:                 # no activation after final Linear
            h = jnp.tanh(h)
    out_ref[...] = h.astype(out_ref.dtype)


def dnn_forward(x, weights, biases, *, block_rows=4096):
    """Fused DNN forward pass as a single batch-tiled Pallas TPU kernel.

    x:       [B, Num_InputVs] float32
    weights: list of [in_i, out_i] float32 arrays (PyTorch W^T)
    biases:  list of [out_i] or [1, out_i] float32 arrays
    """
    num_layers = len(weights)
    assert len(biases) == num_layers

    B, f_in = x.shape
    dims = [f_in] + [w.shape[1] for w in weights]
    out_dim = dims[-1]

    # Batch tile: multiple of 8 sublanes; aim for >= 2 grid steps (so the
    # "parallel" batch axis can split across v7x's two TensorCores); shrink if
    # the VMEM estimate would exceed a v7x-safe budget.
    tb = max(8, min(block_rows, _round_up(-(-B // 2), 8)))
    while tb > 8 and _vmem_bytes(tb, dims) > (40 << 20):
        tb = max(8, _round_up(tb // 2, 8))
    grid = (pl.cdiv(B, tb),)

    # Operands: natural widths, f32 everywhere (exact PyTorch parity).
    operands = [x.astype(jnp.float32)]
    for w, b in zip(weights, biases):
        operands.append(w.astype(jnp.float32))
        operands.append(jnp.reshape(b, (1, -1)).astype(jnp.float32))

    # BlockSpecs: x/out move with the grid; params are grid-invariant, so
    # Pallas keeps them resident in VMEM (no re-DMA across grid steps).
    in_specs = [pl.BlockSpec((tb, f_in), lambda i: (i, 0))]
    for li in range(num_layers):
        in_specs.append(
            pl.BlockSpec((dims[li], dims[li + 1]), lambda i: (0, 0)))
        in_specs.append(pl.BlockSpec((1, dims[li + 1]), lambda i: (0, 0)))
    out_spec = pl.BlockSpec((tb, out_dim), lambda i: (i, 0))

    # VMEM limit derived from actual tile sizes (with 2x headroom), kept well
    # under v7x's 64 MiB physical VMEM.
    vmem_limit = int(min(max(2 * _vmem_bytes(tb, dims), 16 << 20), 56 << 20))

    # Advisory cost estimate from true (unpadded) dims.
    flops = 2 * B * sum(dims[i] * dims[i + 1] for i in range(num_layers))
    transcendentals = B * sum(dims[1:-1])
    bytes_accessed = (
        B * f_in * 4
        + sum(int(op.size) * op.dtype.itemsize for op in operands[1:])
        + B * out_dim * 4)

    kernel = functools.partial(_mlp_kernel, num_layers)

    y = pl.pallas_call(
        kernel,
        out_shape=jax.ShapeDtypeStruct((B, out_dim), jnp.float32),
        grid=grid,
        in_specs=in_specs,
        out_specs=out_spec,
        compiler_params=pltpu.CompilerParams(
            dimension_semantics=("parallel",),
            vmem_limit_bytes=vmem_limit,
        ),
        cost_estimate=pl.CostEstimate(
            flops=int(flops),
            transcendentals=int(transcendentals),
            bytes_accessed=int(bytes_accessed),
        ),
    )(*operands)

    return y


def init_dnn_params(key, num_hidden_layers, num_nodes, num_inputs, num_outputs):
    """Deterministic init matching the DNN module's layer shapes.

    Layer stack: Linear(in, nodes) -> Tanh -> [Linear(nodes, nodes) -> Tanh]*(H-1)
                 -> Linear(nodes, out)
    Uses uniform(-1/sqrt(fan_in), 1/sqrt(fan_in)) like torch.nn.Linear default.
    Weights are stored as [in, out] (PyTorch W^T).
    """
    dims = [num_inputs] + [num_nodes] * num_hidden_layers + [num_outputs]
    weights, biases = [], []
    for i in range(len(dims) - 1):
        fan_in, fan_out = dims[i], dims[i + 1]
        key, wk, bk = jax.random.split(key, 3)
        bound = 1.0 / jnp.sqrt(jnp.float32(fan_in))
        w = jax.random.uniform(wk, (fan_in, fan_out), jnp.float32, -bound, bound)
        b = jax.random.uniform(bk, (1, fan_out), jnp.float32, -bound, bound)
        weights.append(w)
        biases.append(b)
    return weights, biases


def dnn_reference(x, weights, biases):
    """Pure-JAX f32 reference (same math as the PyTorch module)."""
    n = len(weights)
    h = x.astype(jnp.float32)
    for i, (w, b) in enumerate(zip(weights, biases)):
        h = jnp.dot(h, w, precision=jax.lax.Precision.HIGHEST) \
            + jnp.reshape(b, (1, -1))
        if i < n - 1:
            h = jnp.tanh(h)
    return h


if __name__ == "__main__":
    # Small, module-consistent shapes.
    Num_HiddenLayers = 3
    Num_Nodes = 32
    Num_InputVs = 16
    Num_Outputs = 4
    batch = 64

    key = jax.random.PRNGKey(0)
    key, xk = jax.random.split(key)
    x = jax.random.normal(xk, (batch, Num_InputVs), jnp.float32)

    weights, biases = init_dnn_params(
        key, Num_HiddenLayers, Num_Nodes, Num_InputVs, Num_Outputs
    )

    # block_rows=32 so this small example exercises a multi-step grid (64/32=2),
    # matching the >=2-step requirement for v7x megacore sharding.
    y = dnn_forward(x, weights, biases, block_rows=32)
    y = jax.block_until_ready(y)

    y_ref = dnn_reference(x, weights, biases)
    assert y.shape == (batch, Num_Outputs)
    assert jnp.allclose(y, y_ref, atol=2e-3, rtol=2e-3), "mismatch vs reference"

    print("KERNEL_OK")
</pallas_src>

<mosaic_0001>
module attributes {stable_mosaic.version = 11 : i64} {
  func.func @_mlp_kernel(%arg0: i32, %arg1: memref<32x16xf32, #tpu.memory_space<vmem>>, %arg2: memref<16x32xf32, #tpu.memory_space<vmem>>, %arg3: memref<1x32xf32, #tpu.memory_space<vmem>>, %arg4: memref<32x32xf32, #tpu.memory_space<vmem>>, %arg5: memref<1x32xf32, #tpu.memory_space<vmem>>, %arg6: memref<32x32xf32, #tpu.memory_space<vmem>>, %arg7: memref<1x32xf32, #tpu.memory_space<vmem>>, %arg8: memref<32x4xf32, #tpu.memory_space<vmem>>, %arg9: memref<1x4xf32, #tpu.memory_space<vmem>>, %arg10: memref<32x4xf32, #tpu.memory_space<vmem>>) attributes {dimension_semantics = [#tpu.dimension_semantics<parallel>], iteration_bounds = array<i64: 2>, scalar_prefetch = 0 : i64, scratch_operands = 0 : i64, tpu.core_type = #tpu.core_type<tc>, window_params = [{transform_indices = @transform_0, window_bounds = array<i64: 32, 16>}, {pipeline_mode = #tpu.pipeline_mode<synchronous>, transform_indices = @transform_1, window_bounds = array<i64: 16, 32>}, {pipeline_mode = #tpu.pipeline_mode<synchronous>, transform_indices = @transform_2, window_bounds = array<i64: 1, 32>}, {pipeline_mode = #tpu.pipeline_mode<synchronous>, transform_indices = @transform_3, window_bounds = array<i64: 32, 32>}, {pipeline_mode = #tpu.pipeline_mode<synchronous>, transform_indices = @transform_4, window_bounds = array<i64: 1, 32>}, {pipeline_mode = #tpu.pipeline_mode<synchronous>, transform_indices = @transform_5, window_bounds = array<i64: 32, 32>}, {pipeline_mode = #tpu.pipeline_mode<synchronous>, transform_indices = @transform_6, window_bounds = array<i64: 1, 32>}, {pipeline_mode = #tpu.pipeline_mode<synchronous>, transform_indices = @transform_7, window_bounds = array<i64: 32, 4>}, {pipeline_mode = #tpu.pipeline_mode<synchronous>, transform_indices = @transform_8, window_bounds = array<i64: 1, 4>}, {transform_indices = @transform_9, window_bounds = array<i64: 32, 4>}]} {
    %c0 = arith.constant 0 : index
    %c0_0 = arith.constant 0 : index
    %0 = vector.load %arg1[%c0, %c0_0] : memref<32x16xf32, #tpu.memory_space<vmem>>, vector<32x16xf32>
    %c0_1 = arith.constant 0 : index
    %c0_2 = arith.constant 0 : index
    %1 = vector.load %arg2[%c0_1, %c0_2] : memref<16x32xf32, #tpu.memory_space<vmem>>, vector<16x32xf32>
    %c0_3 = arith.constant 0 : index
    %c0_4 = arith.constant 0 : index
    %2 = vector.load %arg3[%c0_3, %c0_4] : memref<1x32xf32, #tpu.memory_space<vmem>>, vector<1x32xf32>
    %cst = arith.constant dense<0.000000e+00> : vector<32x32xf32>
    %3 = tpu.matmul %0, %1, %cst {dimension_numbers = #tpu.dot_dimension_numbers<[1], [0], [0], [1], [0, 0, 1, 1], [], []>} : vector<32x16xf32>, vector<16x32xf32>, vector<32x32xf32> -> vector<32x32xf32>
    %4 = vector.broadcast %2 : vector<1x32xf32> to vector<32x32xf32>
    %5 = arith.addf %3, %4 : vector<32x32xf32>
    %6 = math.tanh %5 : vector<32x32xf32>
    %c0_5 = arith.constant 0 : index
    %c0_6 = arith.constant 0 : index
    %7 = vector.load %arg4[%c0_5, %c0_6] : memref<32x32xf32, #tpu.memory_space<vmem>>, vector<32x32xf32>
    %c0_7 = arith.constant 0 : index
    %c0_8 = arith.constant 0 : index
    %8 = vector.load %arg5[%c0_7, %c0_8] : memref<1x32xf32, #tpu.memory_space<vmem>>, vector<1x32xf32>
    %cst_9 = arith.constant dense<0.000000e+00> : vector<32x32xf32>
    %9 = tpu.matmul %6, %7, %cst_9 {dimension_numbers = #tpu.dot_dimension_numbers<[1], [0], [0], [1], [0, 0, 1, 1], [], []>} : vector<32x32xf32>, vector<32x32xf32>, vector<32x32xf32> -> vector<32x32xf32>
    %10 = vector.broadcast %8 : vector<1x32xf32> to vector<32x32xf32>
    %11 = arith.addf %9, %10 : vector<32x32xf32>
    %12 = math.tanh %11 : vector<32x32xf32>
    %c0_10 = arith.constant 0 : index
    %c0_11 = arith.constant 0 : index
    %13 = vector.load %arg6[%c0_10, %c0_11] : memref<32x32xf32, #tpu.memory_space<vmem>>, vector<32x32xf32>
    %c0_12 = arith.constant 0 : index
    %c0_13 = arith.constant 0 : index
    %14 = vector.load %arg7[%c0_12, %c0_13] : memref<1x32xf32, #tpu.memory_space<vmem>>, vector<1x32xf32>
    %cst_14 = arith.constant dense<0.000000e+00> : vector<32x32xf32>
    %15 = tpu.matmul %12, %13, %cst_14 {dimension_numbers = #tpu.dot_dimension_numbers<[1], [0], [0], [1], [0, 0, 1, 1], [], []>} : vector<32x32xf32>, vector<32x32xf32>, vector<32x32xf32> -> vector<32x32xf32>
    %16 = vector.broadcast %14 : vector<1x32xf32> to vector<32x32xf32>
    %17 = arith.addf %15, %16 : vector<32x32xf32>
    %18 = math.tanh %17 : vector<32x32xf32>
    %c0_15 = arith.constant 0 : index
    %c0_16 = arith.constant 0 : index
    %19 = vector.load %arg8[%c0_15, %c0_16] : memref<32x4xf32, #tpu.memory_space<vmem>>, vector<32x4xf32>
    %c0_17 = arith.constant 0 : index
    %c0_18 = arith.constant 0 : index
    %20 = vector.load %arg9[%c0_17, %c0_18] : memref<1x4xf32, #tpu.memory_space<vmem>>, vector<1x4xf32>
    %cst_19 = arith.constant dense<0.000000e+00> : vector<32x4xf32>
    %21 = tpu.matmul %18, %19, %cst_19 {dimension_numbers = #tpu.dot_dimension_numbers<[1], [0], [0], [1], [0, 0, 1, 1], [], []>} : vector<32x32xf32>, vector<32x4xf32>, vector<32x4xf32> -> vector<32x4xf32>
    %22 = vector.broadcast %20 : vector<1x4xf32> to vector<32x4xf32>
    %23 = arith.addf %21, %22 : vector<32x4xf32>
    %c0_20 = arith.constant 0 : index
    %c0_21 = arith.constant 0 : index
    %24 = vector.load %arg10[%c0_20, %c0_21] : memref<32x4xf32, #tpu.memory_space<vmem>>, vector<32x4xf32>
    tpu.vector_store %arg10[%c0_20, %c0_21], %23 {strides = array<i32>} : memref<32x4xf32, #tpu.memory_space<vmem>>, vector<32x4xf32>,
    return
  }
  func.func @transform_0(%arg0: i32) -> (i32, i32) {
    %c0_i32 = arith.constant 0 : i32
    %c0_i32_0 = arith.constant 0 : i32
    return %arg0, %c0_i32 : i32, i32
  }
  func.func @transform_1(%arg0: i32) -> (i32, i32) {
    %c0_i32 = arith.constant 0 : i32
    %c0_i32_0 = arith.constant 0 : i32
    %c0_i32_1 = arith.constant 0 : i32
    return %c0_i32, %c0_i32_0 : i32, i32
  }
  func.func @transform_2(%arg0: i32) -> (i32, i32) {
    %c0_i32 = arith.constant 0 : i32
    %c0_i32_0 = arith.constant 0 : i32
    %c0_i32_1 = arith.constant 0 : i32
    return %c0_i32, %c0_i32_0 : i32, i32
  }
  func.func @transform_3(%arg0: i32) -> (i32, i32) {
    %c0_i32 = arith.constant 0 : i32
    %c0_i32_0 = arith.constant 0 : i32
    %c0_i32_1 = arith.constant 0 : i32
    return %c0_i32, %c0_i32_0 : i32, i32
  }
  func.func @transform_4(%arg0: i32) -> (i32, i32) {
    %c0_i32 = arith.constant 0 : i32
    %c0_i32_0 = arith.constant 0 : i32
    %c0_i32_1 = arith.constant 0 : i32
    return %c0_i32, %c0_i32_0 : i32, i32
  }
  func.func @transform_5(%arg0: i32) -> (i32, i32) {
    %c0_i32 = arith.constant 0 : i32
    %c0_i32_0 = arith.constant 0 : i32
    %c0_i32_1 = arith.constant 0 : i32
    return %c0_i32, %c0_i32_0 : i32, i32
  }
  func.func @transform_6(%arg0: i32) -> (i32, i32) {
    %c0_i32 = arith.constant 0 : i32
    %c0_i32_0 = arith.constant 0 : i32
    %c0_i32_1 = arith.constant 0 : i32
    return %c0_i32, %c0_i32_0 : i32, i32
  }
  func.func @transform_7(%arg0: i32) -> (i32, i32) {
    %c0_i32 = arith.constant 0 : i32
    %c0_i32_0 = arith.constant 0 : i32
    %c0_i32_1 = arith.constant 0 : i32
    return %c0_i32, %c0_i32_0 : i32, i32
  }
  func.func @transform_8(%arg0: i32) -> (i32, i32) {
    %c0_i32 = arith.constant 0 : i32
    %c0_i32_0 = arith.constant 0 : i32
    %c0_i32_1 = arith.constant 0 : i32
    return %c0_i32, %c0_i32_0 : i32, i32
  }
  func.func @transform_9(%arg0: i32) -> (i32, i32) {
    %c0_i32 = arith.constant 0 : i32
    %c0_i32_0 = arith.constant 0 : i32
    return %arg0, %c0_i32 : i32, i32
  }
}

</mosaic_0001>

<bundles_post_ra>
// kernel: tpu_custom_call.1
= control target key start
LH: loop header
LB: loop body
LE: loop exit
PB: predicated region body
PF: predicated region fallthrough
CT: control target
= control target key end

     0   :  { %s1048_s30 = smov 0   ;;  %s1138_s0 = inlined_call_operand.vmem [shape: f32[64,16], index: 0, kind: input, shape index: {}]   ;;  %s1139_s1 = inlined_call_operand.vmem [shape: f32[16,32], index: 1, kind: input, shape index: {}]   ;;  %s1140_s2 = inlined_call_operand.vmem [shape: f32[1,32], index: 2, kind: input, shape index: {}]   ;;  %s1141_s3 = inlined_call_operand.vmem [shape: f32[32,32], index: 3, kind: input, shape index: {}]   ;;  %s1142_s4 = inlined_call_operand.vmem [shape: f32[1,32], index: 4, kind: input, shape index: {}]   ;;  %s1143_s5 = inlined_call_operand.vmem [shape: f32[32,32], index: 5, kind: input, shape index: {}]   ;;  %s1144_s6 = inlined_call_operand.vmem [shape: f32[1,32], index: 6, kind: input, shape index: {}]   ;;  %s1145_s7 = inlined_call_operand.vmem [shape: f32[32,4], index: 7, kind: input, shape index: {}]   ;;  %s1146_s8 = inlined_call_operand.vmem [shape: f32[1,4], index: 8, kind: input, shape index: {}]   ;;  %s1147_s9 = inlined_call_operand.vmem [shape: f32[64,4], index: 9, kind: output, shape index: {}]  }
   0x1 LB: > { %s845_s10 = sadd.s32 4294967295, %s996_s30   ;;  %p849_p0 = scmp.ge.s32.totalorder %s996_s30, 1  ;;  %s996_s30 = sphi %s1048_s30, %s19_s30  }
   0x2   : > { %p288_p1 = scmp.lt.s32.totalorder %s996_s30, 3 }
   0x4   : > { %p289_p2 = pnand %p849_p0, %p288_p1 }
   0x5   : > { %s850_s15 = sshll.u32 (!%p289_p2), %s845_s10, 2 }
   0x6   : > { %292 = sbr.rel (%p289_p2) target bundleno = 854 (0x356), region = 56  ;;  %p325_p3 = scmp.lt.s32.totalorder (!%p289_p2), %s850_s15, 7 }
   0xb   : > { %v341_v0 = vld [vmem:[%s1139_s1 + $0x8] sm:$0xff]  ;;  %v340_v1 = vld [vmem:[%s1139_s1] sm:$0xff]  ;;  %s1149_s15 = smov (!%p325_p3, %s850_s15), 7  ;;  %vm349_vm0 = vcmask 130048   ;;  %v454_v6 = vld [vmem:[%s1141_s3 + $0x18] sm:$0xff]  ;;  %vm462_vm1 = vcmask 261120  }
   0xc   : > { %906 = vmatprep.subr.mxu0 %v341_v0  ;;  %s851_s16 = sshll.u32 %s1149_s15, 3  ;;  %v453_v7 = vld [vmem:[%s1141_s3 + $0x10] sm:$0xff]  ;;  %916 = vmatprep.subr.mxu1 %v454_v6  ;;  %v452_v8 = vld [vmem:[%s1141_s3 + $0x8] sm:$0xff]  ;;  %v451_v9 = vld [vmem:[%s1141_s3] sm:$0xff]  ;;  %vm784_vm2 = vcmask 31744  }
   0xd   : > { %907 = vmatpush3.msra.mxu0 %v341_v0  ;;  %s328_s19 = scalar_lea.vmem %s1138_s0, %s851_s16  ;;  %917 = vmatpush3.msra.mxu1 %v454_v6  ;;  %v854_v10 = vld [vmem:[%s1140_s2] ss:$0 sm:$0xff]  ;;  %v567_v23 = vld [vmem:[%s1143_s5 + $0x18] sm:$0xff]  ;;  %v566_v24 = vld [vmem:[%s1143_s5 + $0x10] sm:$0xff]  ;;  %s334_s18 = scalar_lea.vmem %s1147_s9, %s851_s16 }
   0xe   : > { %908 = vmatprep.subr.mxu0 %v340_v1  ;;  %v336_v2 = vld [vmem:[%s328_s19] sm:$0xff]  ;;  %v337_v3 = vld [vmem:[%s328_s19 + $0x8] sm:$0xff]  ;;  %v338_v4 = vld [vmem:[%s328_s19 + $0x10] sm:$0xff]  ;;  %918 = vmatprep.subr.mxu1 %v453_v7 }
   0xf   : > { %909 = vmatpush3.msra.mxu0 %v340_v1  ;;  %910 = vmatprep.mubr.msk.f32.mxu0 %vm349_vm0, %v336_v2  ;;  %v339_v5 = vld [vmem:[%s328_s19 + $0x18] sm:$0xff]  ;;  %v565_v25 = vld [vmem:[%s1143_s5 + $0x8] sm:$0xff]  ;;  %v564_v26 = vld [vmem:[%s1143_s5] sm:$0xff] }
  0x10   : > { %911 = vmatmul.mubr.msk.f32.vlgmr.msra.gmra.mxu0 %vm349_vm0, %v337_v3  ;;  %919 = vmatpush3.msra.mxu1 %v453_v7  ;;  %v859_v27 = vld [vmem:[%s1142_s4] ss:$0 sm:$0xff]  ;;  %v679_v40 = vld [vmem:[%s1145_s7 + $0x18] sm:$0xff]  ;;  %v678_v41 = vld [vmem:[%s1145_s7 + $0x10] sm:$0xff] }
  0x11   : > { %913 = vmatprep.mubr.msk.f32.mxu0 %vm349_vm0, %v338_v4  ;;  %920 = vmatprep.subr.mxu1 %v452_v8  ;;  %v677_v42 = vld [vmem:[%s1145_s7 + $0x8] sm:$0xff]  ;;  %v676_v43 = vld [vmem:[%s1145_s7] sm:$0xff] }
  0x12   : > { %921 = vmatpush3.msra.mxu1 %v452_v8  ;;  %930 = vmatprep.subr.mxu0 %v567_v23  ;;  %v864_v44 = vld [vmem:[%s1144_s6] ss:$0 sm:$0xff] }
  0x13   : > { %922 = vmatprep.subr.mxu1 %v451_v9  ;;  %931 = vmatpush3.msra.mxu0 %v567_v23  ;;  %v869_v58 = vld [vmem:[%s1146_s8] ss:$0 sm:$0xff] }
  0x14   : > { %914 = vmatmul.mubr.msk.f32.gmra.mxu0 %vm349_vm0, %v339_v5  ;;  %923 = vmatpush3.msra.mxu1 %v451_v9 }
  0x15   : > { %932 = vmatprep.subr.mxu0 %v566_v24  ;;  %944 = vmatprep.subr.mxu1 %v679_v40 }
  0x16   : > { %933 = vmatpush3.msra.mxu0 %v566_v24 }
  0x17   : > { %934 = vmatprep.subr.mxu0 %v565_v25 }
  0x18   : > { %935 = vmatpush3.msra.mxu0 %v565_v25 }
  0x19   : > { %936 = vmatprep.subr.mxu0 %v564_v26 }
  0x1a   : > { %937 = vmatpush3.msra.mxu0 %v564_v26 }
  0xd0   : > { %v912_v11 = vpop.f32.mrf.mxu0 }
  0xd1   : > { %v434_v12 = vadd.f32 %v912_v11, %v854_v10 }
  0xd2   : > { %v428_v13 = vpop.f32.mrf.mxu0 }
  0xd3   : > { %v429_v14 = vadd.f32 %v854_v10, %v428_v13 }
  0xd4   : > { %v915_v15 = vpop.f32.mrf.mxu0 }
  0xd5   : > { %966 = vtanh.f32 %v429_v14  ;;  %v444_v16 = vadd.f32 %v915_v15, %v854_v10 }
  0xd6   : > { %968 = vtanh.f32 %v434_v12  ;;  %v438_v17 = vpop.f32.mrf.mxu0 }
  0xd7   : > { %v439_v18 = vadd.f32 %v854_v10, %v438_v17 }
  0xd9   : > { %970 = vtanh.f32 %v439_v18 }
  0xda   : > { %972 = vtanh.f32 %v444_v16 }
  0xe2   : > { %v967_v19 = vpop.eup %966 }
  0xe3   : > { %v969_v20 = vpop.eup %968  ;;  %924 = vmatprep.mubr.msk.f32.mxu1 %vm462_vm1, %v967_v19 }
  0xe4   : > { %925 = vmatmul.mubr.msk.f32.vlgmr.msra.gmra.mxu1 %vm462_vm1, %v969_v20 }
  0xe5   : > { %945 = vmatpush3.msra.mxu1 %v679_v40 }
  0xe6   : > { %v971_v21 = vpop.eup %970  ;;  %946 = vmatprep.subr.mxu1 %v678_v41 }
  0xe7   : > { %v973_v22 = vpop.eup %972  ;;  %927 = vmatprep.mubr.msk.f32.mxu1 %vm462_vm1, %v971_v21  ;;  %947 = vmatpush3.msra.mxu1 %v678_v41 }
  0xe8   : > { %928 = vmatmul.mubr.msk.f32.gmra.mxu1 %vm462_vm1, %v973_v22  ;;  %948 = vmatprep.subr.mxu1 %v677_v42 }
  0xe9   : > { %949 = vmatpush3.msra.mxu1 %v677_v42 }
  0xea   : > { %950 = vmatprep.subr.mxu1 %v676_v43 }
  0xeb   : > { %951 = vmatpush3.msra.mxu1 %v676_v43 }
 0x1a4   : > { %v926_v28 = vpop.f32.mrf.mxu1 }
 0x1a5   : > { %v547_v29 = vadd.f32 %v926_v28, %v859_v27 }
 0x1a6   : > { %v541_v30 = vpop.f32.mrf.mxu1 }
 0x1a7   : > { %v542_v31 = vadd.f32 %v859_v27, %v541_v30 }
 0x1a8   : > { %v929_v32 = vpop.f32.mrf.mxu1 }
 0x1a9   : > { %974 = vtanh.f32 %v542_v31  ;;  %v557_v33 = vadd.f32 %v929_v32, %v859_v27 }
 0x1aa   : > { %976 = vtanh.f32 %v547_v29  ;;  %v551_v34 = vpop.f32.mrf.mxu1 }
 0x1ab   : > { %v552_v35 = vadd.f32 %v859_v27, %v551_v34 }
 0x1ad   : > { %978 = vtanh.f32 %v552_v35 }
 0x1ae   : > { %980 = vtanh.f32 %v557_v33 }
 0x1b6   : > { %v975_v36 = vpop.eup %974 }
 0x1b7   : > { %v977_v37 = vpop.eup %976  ;;  %938 = vmatprep.mubr.msk.f32.mxu0 %vm462_vm1, %v975_v36 }
 0x1b8   : > { %939 = vmatmul.mubr.msk.f32.vlgmr.msra.gmra.mxu0 %vm462_vm1, %v977_v37 }
 0x1ba   : > { %v979_v38 = vpop.eup %978 }
 0x1bb   : > { %v981_v39 = vpop.eup %980  ;;  %941 = vmatprep.mubr.msk.f32.mxu0 %vm462_vm1, %v979_v38 }
 0x1bc   : > { %942 = vmatmul.mubr.msk.f32.gmra.mxu0 %vm462_vm1, %v981_v39 }
 0x278   : > { %v940_v45 = vpop.f32.mrf.mxu0 }
 0x279   : > { %v659_v46 = vadd.f32 %v940_v45, %v864_v44 }
 0x27a   : > { %v653_v47 = vpop.f32.mrf.mxu0 }
 0x27b   : > { %v654_v48 = vadd.f32 %v864_v44, %v653_v47 }
 0x27c   : > { %v943_v49 = vpop.f32.mrf.mxu0 }
 0x27d   : > { %982 = vtanh.f32 %v654_v48  ;;  %v669_v50 = vadd.f32 %v943_v49, %v864_v44 }
 0x27e   : > { %984 = vtanh.f32 %v659_v46  ;;  %v663_v51 = vpop.f32.mrf.mxu0 }
 0x27f   : > { %v664_v52 = vadd.f32 %v864_v44, %v663_v51 }
 0x281   : > { %986 = vtanh.f32 %v664_v52 }
 0x282   : > { %988 = vtanh.f32 %v669_v50 }
 0x28a   : > { %v983_v53 = vpop.eup %982 }
 0x28b   : > { %v985_v54 = vpop.eup %984  ;;  %952 = vmatprep.mubr.msk.f32.mxu1 %vm462_vm1, %v983_v53 }
 0x28c   : > { %953 = vmatmul.mubr.msk.f32.vlgmr.msra.gmra.mxu1 %vm462_vm1, %v985_v54 }
 0x28e   : > { %v987_v55 = vpop.eup %986 }
 0x28f   : > { %v989_v56 = vpop.eup %988  ;;  %955 = vmatprep.mubr.msk.f32.mxu1 %vm462_vm1, %v987_v55 }
 0x290   : > { %956 = vmatmul.mubr.msk.f32.gmra.mxu1 %vm462_vm1, %v989_v56 }
 0x34c   : > { %v954_v57 = vpop.f32.mrf.mxu1 }
 0x34d   : > { %v771_v61 = vadd.f32 %v954_v57, %v869_v58 }
 0x34e   : > { %v765_v59 = vpop.f32.mrf.mxu1 }
 0x34f   : > { %v766_v60 = vadd.f32 %v869_v58, %v765_v59  ;;  %786 = vst.msk [vmem:[%s334_s18 + $0x8] sm:$0xff] %vm784_vm2, %v771_v61 }
 0x350   : > { %v957_v62 = vpop.f32.mrf.mxu1 }
 0x351   : > { %785 = vst.msk [vmem:[%s334_s18] sm:$0xff] %vm784_vm2, %v766_v60  ;;  %v781_v1 = vadd.f32 %v957_v62, %v869_v58 }
 0x352   : > { %v775_v63 = vpop.f32.mrf.mxu1 }
 0x353   : > { %v776_v0 = vadd.f32 %v869_v58, %v775_v63  ;;  %788 = vst.msk [vmem:[%s334_s18 + $0x18] sm:$0xff] %vm784_vm2, %v781_v1 }
 0x355   : > { %787 = vst.msk [vmem:[%s334_s18 + $0x10] sm:$0xff] %vm784_vm2, %v776_v0 }
 0x356 PF: > { %s19_s30 = sadd.s32 1, %s996_s30  }
 0x357   : > { %p16_p4 = scmp.ge.s32.totalorder %s19_s30, 4  }
 0x359   :  { %18 = sbr.rel (!%p16_p4) target bundleno = 1 (0x1), region = 86 }

</bundles_post_ra>
